<compile_context>
chip_gen: v6e
topology: v6e:2x2x1
jax: 0.10.0
libtpu: 0.0.40
codegen_flags: <defaults>
</compile_context>

<pallas_src>
import functools

import jax
import jax.numpy as jnp
from jax import lax
from jax.experimental import pallas as pl
from jax.experimental.pallas import tpu as pltpu


# ---------------------------------------------------------------------------
# Pallas kernel: fused "im2col + matmul + bias" for one batch element
# ---------------------------------------------------------------------------
def _down_conv_kernel(cells_ref, w_ref, b_ref, o_ref):
    # cells_ref: (Hc, Wc, 4*C)    bf16, Hc = Ho+1, Wc = Wo+1 (space-to-depth cells)
    # w_ref:     (2, 2, 4*C, Cout) bf16, reorganized conv weight
    # b_ref:     (1, Cout)         f32, bias
    # o_ref:     (Ho*Wo, Cout)     f32 output tile
    Hc, Wc, K = cells_ref.shape
    Ho, Wo = Hc - 1, Wc - 1
    Cout = o_ref.shape[-1]

    acc = jnp.zeros((Ho * Wo, Cout), jnp.float32)
    # k=2, s=1 conv over the cell grid == original k=4, s=2, p=1 conv.
    # The 4x im2col expansion lives only in VMEM/vregs, never in HBM.
    for dh in range(2):
        for dw in range(2):
            v = cells_ref[dh:dh + Ho, dw:dw + Wo, :]          # (Ho, Wo, 4C) bf16
            v = v.reshape(Ho * Wo, K)
            acc = acc + jnp.dot(v, w_ref[dh, dw],
                                preferred_element_type=jnp.float32)
    o_ref[...] = (acc + b_ref[...]).astype(o_ref.dtype)


# ---------------------------------------------------------------------------
# Downsample forward (matches PyTorch module semantics)
# ---------------------------------------------------------------------------
@functools.partial(jax.jit, static_argnums=(1, 2))
def downsample_forward(x, H, W, weight, bias):
    """x: (B, L, C_in) with L == H*W (row-major h*W + w, as in the module).
    weight: (C_out, C_in, 4, 4) OIHW.  bias: (C_out,).

    Returns (B, (H//2)*(W//2), C_out), identical to Conv2d(k=4, s=2, p=1)
    applied to the NCHW view, then flatten(2).transpose(1, 2).
    """
    B, L, C = x.shape
    assert L == H * W and H % 2 == 0 and W % 2 == 0
    Cout = weight.shape[0]
    Ho, Wo = H // 2, W // 2
    Hc, Wc = Ho + 1, Wo + 1

    # (B, L, C) is already NHWC-flattened: this reshape is free (no transpose).
    x_nhwc = x.reshape(B, H, W, C)

    # pad=1 each side, then space-to-depth into 2x2 "cells":
    #   cells[b, hc, wc, (rh, rw, c)] = x_pad[b, 2*hc + rh, 2*wc + rw, c]
    # XLA fuses pad + transpose + bf16 cast into ~one pass over the input.
    xp = jnp.pad(x_nhwc, ((0, 0), (1, 1), (1, 1), (0, 0)))
    cells = jnp.transpose(xp.reshape(B, Hc, 2, Wc, 2, C), (0, 1, 3, 2, 4, 5))
    cells = cells.reshape(B, Hc, Wc, 4 * C).astype(jnp.bfloat16)

    # Weight OIHW -> (dh, dw, (rh, rw, c), o) so that
    #   conv4x4s2(x)[i, j] = sum_{dh,dw} cells[i+dh, j+dw, :] @ w_mat[dh, dw]
    w6 = weight.reshape(Cout, C, 2, 2, 2, 2)            # (o, c, dh, rh, dw, rw)
    w6 = jnp.transpose(w6, (2, 4, 3, 5, 1, 0))          # (dh, dw, rh, rw, c, o)
    w_mat = w6.reshape(2, 2, 4 * C, Cout).astype(jnp.bfloat16)
    b_mat = bias.reshape(1, Cout).astype(jnp.float32)

    out = pl.pallas_call(
        _down_conv_kernel,
        out_shape=jax.ShapeDtypeStruct((B, Ho * Wo, Cout), x.dtype),
        grid=(B,),
        in_specs=[
            # per-batch cell block (batch dim squeezed away)
            pl.BlockSpec((None, Hc, Wc, 4 * C), lambda b: (b, 0, 0, 0)),
            # full reorganized weight, replicated across grid steps
            pl.BlockSpec((2, 2, 4 * C, Cout), lambda b: (0, 0, 0, 0)),
            # bias, replicated
            pl.BlockSpec((1, Cout), lambda b: (0, 0)),
        ],
        out_specs=pl.BlockSpec((None, Ho * Wo, Cout), lambda b: (b, 0, 0)),
        compiler_params=pltpu.CompilerParams(
            dimension_semantics=("parallel",)),
    )(cells, w_mat, b_mat)
    return out


# ---------------------------------------------------------------------------
# Reference (pure JAX) for verification
# ---------------------------------------------------------------------------
def downsample_reference(x, H, W, weight, bias):
    B, L, C = x.shape
    Cout = weight.shape[0]
    x_nchw = jnp.transpose(x, (0, 2, 1)).reshape(B, C, H, W)
    y = lax.conv_general_dilated(
        x_nchw, weight, window_strides=(2, 2),
        padding=((1, 1), (1, 1)),
        dimension_numbers=("NCHW", "OIHW", "NCHW"))
    y = y + bias[None, :, None, None]
    return jnp.transpose(y.reshape(B, Cout, -1), (0, 2, 1))


if __name__ == "__main__":
    key = jax.random.PRNGKey(0)
    k_x, k_w, k_b = jax.random.split(key, 3)

    B, C_in, C_out = 2, 4, 8
    H = W = 16
    L = H * W

    x = jax.random.normal(k_x, (B, L, C_in), dtype=jnp.float32)
    # deterministic "kaiming-ish" init for Conv2d(in=4, out=8, k=4)
    fan_in = C_in * 4 * 4
    weight = jax.random.normal(k_w, (C_out, C_in, 4, 4), dtype=jnp.float32) * (1.0 / fan_in) ** 0.5
    bias = jax.random.normal(k_b, (C_out,), dtype=jnp.float32) * 0.01

    out = downsample_forward(x, H, W, weight, bias)
    out = jax.block_until_ready(out)

    ref = downsample_reference(x, H, W, weight, bias)
    assert out.shape == (B, (H // 2) * (W // 2), C_out), out.shape
    # bf16 MXU operands with f32 accumulation -> loosened tolerance vs f32 ref
    err = float(jnp.max(jnp.abs(out - ref)))
    assert err < 5e-2, err

    print("KERNEL_OK")
</pallas_src>

<mosaic_0001>
module attributes {stable_mosaic.version = 11 : i64} {
  func.func @_down_conv_kernel(%arg0: i32, %arg1: memref<1x9x9x16xbf16, #tpu.memory_space<vmem>>, %arg2: memref<2x2x16x8xbf16, #tpu.memory_space<vmem>>, %arg3: memref<1x8xf32, #tpu.memory_space<vmem>>, %arg4: memref<1x64x8xf32, #tpu.memory_space<vmem>>) attributes {dimension_semantics = [#tpu.dimension_semantics<parallel>], iteration_bounds = array<i64: 2>, scalar_prefetch = 0 : i64, scratch_operands = 0 : i64, tpu.core_type = #tpu.core_type<tc>, window_params = [{transform_indices = @transform_0, window_bounds = array<i64: 1, 9, 9, 16>}, {pipeline_mode = #tpu.pipeline_mode<synchronous>, transform_indices = @transform_1, window_bounds = array<i64: 2, 2, 16, 8>}, {pipeline_mode = #tpu.pipeline_mode<synchronous>, transform_indices = @transform_2, window_bounds = array<i64: 1, 8>}, {transform_indices = @transform_3, window_bounds = array<i64: 1, 64, 8>}]} {
    %cst = arith.constant 0.000000e+00 : f32
    %0 = vector.broadcast %cst : f32 to vector<64x8xf32>
    %c0 = arith.constant 0 : index
    %c0_0 = arith.constant 0 : index
    %c0_1 = arith.constant 0 : index
    %c0_2 = arith.constant 0 : index
    %1 = vector.load %arg1[%c0, %c0_0, %c0_1, %c0_2] : memref<1x9x9x16xbf16, #tpu.memory_space<vmem>>, vector<1x8x8x16xbf16>
    %2 = vector.shape_cast %1 : vector<1x8x8x16xbf16> to vector<8x8x16xbf16>
    %3 = vector.shape_cast %2 : vector<8x8x16xbf16> to vector<64x16xbf16>
    %c0_3 = arith.constant 0 : index
    %c0_4 = arith.constant 0 : index
    %c0_5 = arith.constant 0 : index
    %c0_6 = arith.constant 0 : index
    %4 = vector.load %arg2[%c0_3, %c0_4, %c0_5, %c0_6] : memref<2x2x16x8xbf16, #tpu.memory_space<vmem>>, vector<1x1x16x8xbf16>
    %5 = vector.shape_cast %4 : vector<1x1x16x8xbf16> to vector<16x8xbf16>
    %cst_7 = arith.constant dense<0.000000e+00> : vector<64x8xf32>
    %6 = tpu.matmul %3, %5, %cst_7 {dimension_numbers = #tpu.dot_dimension_numbers<[1], [0], [0], [1], [0, 0, 1, 1], [], []>} : vector<64x16xbf16>, vector<16x8xbf16>, vector<64x8xf32> -> vector<64x8xf32>
    %7 = arith.addf %0, %6 : vector<64x8xf32>
    %c0_8 = arith.constant 0 : index
    %c0_9 = arith.constant 0 : index
    %c1 = arith.constant 1 : index
    %c0_10 = arith.constant 0 : index
    %8 = vector.load %arg1[%c0_8, %c0_9, %c1, %c0_10] : memref<1x9x9x16xbf16, #tpu.memory_space<vmem>>, vector<1x8x8x16xbf16>
    %9 = vector.shape_cast %8 : vector<1x8x8x16xbf16> to vector<8x8x16xbf16>
    %10 = vector.shape_cast %9 : vector<8x8x16xbf16> to vector<64x16xbf16>
    %c0_11 = arith.constant 0 : index
    %c1_12 = arith.constant 1 : index
    %c0_13 = arith.constant 0 : index
    %c0_14 = arith.constant 0 : index
    %11 = vector.load %arg2[%c0_11, %c1_12, %c0_13, %c0_14] : memref<2x2x16x8xbf16, #tpu.memory_space<vmem>>, vector<1x1x16x8xbf16>
    %12 = vector.shape_cast %11 : vector<1x1x16x8xbf16> to vector<16x8xbf16>
    %cst_15 = arith.constant dense<0.000000e+00> : vector<64x8xf32>
    %13 = tpu.matmul %10, %12, %cst_15 {dimension_numbers = #tpu.dot_dimension_numbers<[1], [0], [0], [1], [0, 0, 1, 1], [], []>} : vector<64x16xbf16>, vector<16x8xbf16>, vector<64x8xf32> -> vector<64x8xf32>
    %14 = arith.addf %7, %13 : vector<64x8xf32>
    %c0_16 = arith.constant 0 : index
    %c1_17 = arith.constant 1 : index
    %c0_18 = arith.constant 0 : index
    %c0_19 = arith.constant 0 : index
    %15 = vector.load %arg1[%c0_16, %c1_17, %c0_18, %c0_19] : memref<1x9x9x16xbf16, #tpu.memory_space<vmem>>, vector<1x8x8x16xbf16>
    %16 = vector.shape_cast %15 : vector<1x8x8x16xbf16> to vector<8x8x16xbf16>
    %17 = vector.shape_cast %16 : vector<8x8x16xbf16> to vector<64x16xbf16>
    %c1_20 = arith.constant 1 : index
    %c0_21 = arith.constant 0 : index
    %c0_22 = arith.constant 0 : index
    %c0_23 = arith.constant 0 : index
    %18 = vector.load %arg2[%c1_20, %c0_21, %c0_22, %c0_23] : memref<2x2x16x8xbf16, #tpu.memory_space<vmem>>, vector<1x1x16x8xbf16>
    %19 = vector.shape_cast %18 : vector<1x1x16x8xbf16> to vector<16x8xbf16>
    %cst_24 = arith.constant dense<0.000000e+00> : vector<64x8xf32>
    %20 = tpu.matmul %17, %19, %cst_24 {dimension_numbers = #tpu.dot_dimension_numbers<[1], [0], [0], [1], [0, 0, 1, 1], [], []>} : vector<64x16xbf16>, vector<16x8xbf16>, vector<64x8xf32> -> vector<64x8xf32>
    %21 = arith.addf %14, %20 : vector<64x8xf32>
    %c0_25 = arith.constant 0 : index
    %c1_26 = arith.constant 1 : index
    %c1_27 = arith.constant 1 : index
    %c0_28 = arith.constant 0 : index
    %22 = vector.load %arg1[%c0_25, %c1_26, %c1_27, %c0_28] : memref<1x9x9x16xbf16, #tpu.memory_space<vmem>>, vector<1x8x8x16xbf16>
    %23 = vector.shape_cast %22 : vector<1x8x8x16xbf16> to vector<8x8x16xbf16>
    %24 = vector.shape_cast %23 : vector<8x8x16xbf16> to vector<64x16xbf16>
    %c1_29 = arith.constant 1 : index
    %c1_30 = arith.constant 1 : index
    %c0_31 = arith.constant 0 : index
    %c0_32 = arith.constant 0 : index
    %25 = vector.load %arg2[%c1_29, %c1_30, %c0_31, %c0_32] : memref<2x2x16x8xbf16, #tpu.memory_space<vmem>>, vector<1x1x16x8xbf16>
    %26 = vector.shape_cast %25 : vector<1x1x16x8xbf16> to vector<16x8xbf16>
    %cst_33 = arith.constant dense<0.000000e+00> : vector<64x8xf32>
    %27 = tpu.matmul %24, %26, %cst_33 {dimension_numbers = #tpu.dot_dimension_numbers<[1], [0], [0], [1], [0, 0, 1, 1], [], []>} : vector<64x16xbf16>, vector<16x8xbf16>, vector<64x8xf32> -> vector<64x8xf32>
    %28 = arith.addf %21, %27 : vector<64x8xf32>
    %c0_34 = arith.constant 0 : index
    %c0_35 = arith.constant 0 : index
    %29 = vector.load %arg3[%c0_34, %c0_35] : memref<1x8xf32, #tpu.memory_space<vmem>>, vector<1x8xf32>
    %30 = vector.broadcast %29 : vector<1x8xf32> to vector<64x8xf32>
    %31 = arith.addf %28, %30 : vector<64x8xf32>
    %c0_36 = arith.constant 0 : index
    %c0_37 = arith.constant 0 : index
    %c0_38 = arith.constant 0 : index
    %32 = vector.load %arg4[%c0_36, %c0_37, %c0_38] : memref<1x64x8xf32, #tpu.memory_space<vmem>>, vector<1x64x8xf32>
    %33 = vector.shape_cast %32 : vector<1x64x8xf32> to vector<64x8xf32>
    %34 = vector.shape_cast %31 : vector<64x8xf32> to vector<1x64x8xf32>
    tpu.vector_store %arg4[%c0_36, %c0_37, %c0_38], %34 {strides = array<i32>} : memref<1x64x8xf32, #tpu.memory_space<vmem>>, vector<1x64x8xf32>,
    return
  }
  func.func @transform_0(%arg0: i32) -> (i32, i32, i32, i32) {
    %c0_i32 = arith.constant 0 : i32
    %c0_i32_0 = arith.constant 0 : i32
    %c0_i32_1 = arith.constant 0 : i32
    %c0_i32_2 = arith.constant 0 : i32
    return %arg0, %c0_i32, %c0_i32_0, %c0_i32_1 : i32, i32, i32, i32
  }
  func.func @transform_1(%arg0: i32) -> (i32, i32, i32, i32) {
    %c0_i32 = arith.constant 0 : i32
    %c0_i32_0 = arith.constant 0 : i32
    %c0_i32_1 = arith.constant 0 : i32
    %c0_i32_2 = arith.constant 0 : i32
    %c0_i32_3 = arith.constant 0 : i32
    return %c0_i32, %c0_i32_0, %c0_i32_1, %c0_i32_2 : i32, i32, i32, i32
  }
  func.func @transform_2(%arg0: i32) -> (i32, i32) {
    %c0_i32 = arith.constant 0 : i32
    %c0_i32_0 = arith.constant 0 : i32
    %c0_i32_1 = arith.constant 0 : i32
    return %c0_i32, %c0_i32_0 : i32, i32
  }
  func.func @transform_3(%arg0: i32) -> (i32, i32, i32) {
    %c0_i32 = arith.constant 0 : i32
    %c0_i32_0 = arith.constant 0 : i32
    %c0_i32_1 = arith.constant 0 : i32
    return %arg0, %c0_i32, %c0_i32_0 : i32, i32, i32
  }
}

</mosaic_0001>

<bundles_post_ra>
// kernel: downsample_forward.1
= control target key start
LH: loop header
LB: loop body
LE: loop exit
PB: predicated region body
PF: predicated region fallthrough
CT: control target
= control target key end

     0   :  { %s1130_s12 = smov 0   ;;  %s1280_s0 = inlined_call_operand.vmem [shape: bf16[2,9,9,16], index: 0, kind: input, shape index: {}]   ;;  %s1281_s1 = inlined_call_operand.vmem [shape: bf16[2,2,16,8], index: 1, kind: input, shape index: {}]   ;;  %s1282_s2 = inlined_call_operand.vmem [shape: f32[1,8], index: 2, kind: input, shape index: {}]   ;;  %s1283_s3 = inlined_call_operand.vmem [shape: f32[2,64,8], index: 3, kind: output, shape index: {}]  }
   0x1 LB: > { %s943_s13 = sadd.s32 4294967295, %s1108_s12   ;;  %p947_p0 = scmp.ge.s32.totalorder %s1108_s12, 1  ;;  %s1108_s12 = sphi %s1130_s12, %s13_s12  }
   0x2   : > { %p137_p1 = scmp.lt.s32.totalorder %s1108_s12, 3 }
   0x4   : > { %p138_p2 = pnand %p947_p0, %p137_p1 }
   0x5   : > { %p161_p3 = scmp.lt.s32.totalorder (!%p138_p2), %s943_s13, 1 }
   0x6   : > { %141 = sbr.rel (%p138_p2) target bundleno = 265 (0x109), region = 32 }
   0xb   : > { %v1090_v0 = vld [vmem:[%s1281_s1] sm:$0xff]   ;;  %v1091_v1 = vld [vmem:[%s1281_s1 + $0x8] sm:$0xff]   ;;  %s1287_s13 = smov (!%p161_p3, %s943_s13), 1  ;;  %v1149_v2 = vld [vmem:[%s1281_s1 + $0x10] sm:$0xff]   ;;  %vm326_vm0 = vcmask 130048   ;;  %vm879_vm4 = vcmask 64512  }
   0xc   : > { %1051 = vmatprep.subr.bf16.mxu1 %v1090_v0  ;;  %1041 = vmatprep.subr.bf16.mxu0 %v1091_v1  ;;  %s1081_s20 = smul.u32 72, %s1287_s13  ;;  %v1095_v3 = vld [vmem:[%s1281_s1 + $0x18] sm:$0xff]   ;;  %vm190_vm1 = vsmask.f32 3328  ;;  %vm191_vm2 = vsmask.f32 7440 }
   0xd   : > { %1052 = vmatpush3.bf16.msra.mxu1 %v1090_v0  ;;  %1042 = vmatpush3.bf16.msra.mxu0 %v1091_v1  ;;  %vm1172_vm3 = vmor %vm190_vm1, %vm191_vm2  ;;  %s1020_s26 = sshll.u32 %s1287_s13, 6 }
   0xe   : > { %1061 = vmatprep.subr.bf16.mxu0 %v1149_v2  ;;  %s1159_s25 = scalar_lea.vmem %s1280_s0, %s1081_s20  ;;  %1071 = vmatprep.subr.bf16.mxu1 %v1095_v3  ;;  %s1259_s4 = scalar_lea.vmem %s1283_s3, %s1020_s26 }
   0xf   : > { %v172_v4 = vld [vmem:[%s1159_s25] sm:$0xf]  ;;  %v173_v5 = vld [vmem:[%s1159_s25 + $0x8] sm:$0xf]  ;;  %v174_v6 = vld [vmem:[%s1159_s25 + $0x10] sm:$0xf] }
  0x10   : > { %v194_v7 = vshrl.u32 %v172_v4, 16  ;;  %v197_v8 = vshll.u32 %v172_v4, 16  ;;  %v208_v9 = vshrl.u32 %v173_v5, 16  ;;  %v211_v10 = vshll.u32 %v173_v5, 16  ;;  %v175_v11 = vld [vmem:[%s1159_s25 + $0x18] sm:$0xf] }
  0x11   : > { %v962_v12 = vcombine.low %v172_v4, %v173_v5  ;;  %v222_v13 = vshrl.u32 %v174_v6, 16  ;;  %v225_v14 = vshll.u32 %v174_v6, 16  ;;  %v236_v15 = vshrl.u32 %v175_v11, 16  ;;  %v182_v16 = vld [vmem:[%s1159_s25 + $0x4] sm:$0x1] }
  0x12   : > { %v196_v17 = vrot.slane %v194_v7, 4  ;;  %v199_v18 = vrot.slane %v197_v8, 5  ;;  %v210_v19 = vrot.slane %v208_v9, 4  ;;  %v213_v20 = vrot.slane %v211_v10, 5  ;;  %v183_v21 = vld [vmem:[%s1159_s25 + $0xc] sm:$0x1] }
  0x13   : > { %1053 = vmatprep.mubr.msk.bf16.mxu1 %vm326_vm0, %v962_v12  ;;  %v224_v22 = vrot.slane %v222_v13, 4  ;;  %v227_v23 = vrot.slane %v225_v14, 5  ;;  %v238_v24 = vrot.slane %v236_v15, 4  ;;  %v239_v25 = vshll.u32 %v175_v11, 16  ;;  %v184_v26 = vld [vmem:[%s1159_s25 + $0x14] sm:$0x1] }
  0x14   : > { %v963_v27 = vcombine.low %v174_v6, %v175_v11  ;;  %v200_v28 = vor.u32 %v199_v18, %v196_v17  ;;  %v203_v29 = vshll.u32 %v182_v16, 16  ;;  %v214_v30 = vor.u32 %v213_v20, %v210_v19  ;;  %v185_v31 = vld [vmem:[%s1159_s25 + $0x1c] sm:$0x1]  ;;  %v176_v37 = vld [vmem:[%s1159_s25 + $0x20] sm:$0xf] }
  0x15   : > { %v241_v32 = vrot.slane %v239_v25, 5  ;;  %v217_v34 = vshll.u32 %v183_v21, 16  ;;  %v228_v35 = vor.u32 %v227_v23, %v224_v22  ;;  %v231_v36 = vshll.u32 %v184_v26, 16  ;;  %v177_v42 = vld [vmem:[%s1159_s25 + $0x28] sm:$0xf] }
  0x16   : > { %1054 = vmatmul.mubr.msk.bf16.vlgmr.msra.gmra.mxu1 %vm326_vm0, %v963_v27  ;;  %v201_v38 = vrot.slane %v200_v28, 4  ;;  %v205_v39 = vrot.slane %v203_v29, 5  ;;  %v215_v40 = vrot.slane %v214_v30, 4  ;;  %v245_v41 = vshll.u32 %v185_v31, 16  ;;  %v178_v51 = vld [vmem:[%s1159_s25 + $0x30] sm:$0xf] }
  0x17   : > { %v219_v43 = vrot.slane %v217_v34, 5  ;;  %v229_v44 = vrot.slane %v228_v35, 4  ;;  %v233_v45 = vrot.slane %v231_v36, 5  ;;  %v242_v46 = vor.u32 %v241_v32, %v238_v24  ;;  %1072 = vmatpush3.bf16.msra.mxu1 %v1095_v3  ;;  %v179_v56 = vld [vmem:[%s1159_s25 + $0x38] sm:$0xf] }
  0x18   : > { %v206_v47 = vsel %vm1172_vm3, %v201_v38, %v205_v39  ;;  %v247_v48 = vrot.slane %v245_v41, 5  ;;  %v250_v49 = vshrl.u32 %v176_v37, 16  ;;  %v253_v50 = vshll.u32 %v176_v37, 16  ;;  %v186_v1 = vld [vmem:[%s1159_s25 + $0x24] sm:$0x1] }
  0x19   : > { %v220_v52 = vsel %vm1172_vm3, %v215_v40, %v219_v43  ;;  %v234_v53 = vsel %vm1172_vm3, %v229_v44, %v233_v45  ;;  %v243_v54 = vrot.slane %v242_v46, 4  ;;  %v264_v55 = vshrl.u32 %v177_v42, 16  ;;  %v187_v3 = vld [vmem:[%s1159_s25 + $0x2c] sm:$0x1]  ;;  %v188_v8 = vld [vmem:[%s1159_s25 + $0x34] sm:$0x1] }
  0x1a   : > { %v953_v57 = vcombine.low %v206_v47, %v220_v52  ;;  %v252_v58 = vrot.slane %v250_v49, 4  ;;  %v255_v59 = vrot.slane %v253_v50, 5  ;;  %v267_v60 = vshll.u32 %v177_v42, 16  ;;  %v189_v13 = vld [vmem:[%s1159_s25 + $0x3c] sm:$0x1] }
  0x1b   : > { %v248_v61 = vsel %vm1172_vm3, %v243_v54, %v247_v48  ;;  %v266_v62 = vrot.slane %v264_v55, 4  ;;  %v964_v63 = vcombine.low %v176_v37, %v177_v42  ;;  %v278_v0 = vshrl.u32 %v178_v51, 16  ;;  %v990_v14 = vld [vmem:[%s1159_s25 + $0x8] sm:$0xf]  ;;  %v991_v19 = vld [vmem:[%s1159_s25 + $0xc] sm:$0x1] }
  0x1c   : > { %1043 = vmatprep.mubr.msk.bf16.mxu0 %vm326_vm0, %v953_v57  ;;  %v954_v4 = vcombine.low %v234_v53, %v248_v61  ;;  %v269_v5 = vrot.slane %v267_v60, 5  ;;  %v281_v6 = vshll.u32 %v178_v51, 16  ;;  %v292_v7 = vshrl.u32 %v179_v56, 16  ;;  %v992_v24 = vld [vmem:[%s1159_s25 + $0x10] sm:$0xf] }
  0x1d   : > { %1057 = vmatprep.mubr.msk.bf16.mxu1 %vm326_vm0, %v964_v63  ;;  %v280_v9 = vrot.slane %v278_v0, 4  ;;  %v295_v10 = vshll.u32 %v179_v56, 16  ;;  %v965_v11 = vcombine.low %v178_v51, %v179_v56  ;;  %v256_v12 = vor.u32 %v255_v59, %v252_v58  ;;  %v993_v29 = vld [vmem:[%s1159_s25 + $0x14] sm:$0x1]  ;;  %v995_v39 = vld [vmem:[%s1159_s25 + $0x1c] sm:$0x1] }
  0x1e   : > { %1044 = vmatmul.mubr.msk.bf16.vlgmr.msra.gmra.mxu0 %vm326_vm0, %v954_v4  ;;  %v283_v15 = vrot.slane %v281_v6, 5  ;;  %v294_v16 = vrot.slane %v292_v7, 4  ;;  %v259_v17 = vshll.u32 %v186_v1, 16  ;;  %v270_v18 = vor.u32 %v269_v5, %v266_v62  ;;  %v996_v44 = vld [vmem:[%s1159_s25 + $0x20] sm:$0xf] }
  0x1f   : > { %1062 = vmatpush3.bf16.msra.mxu0 %v1149_v2  ;;  %v297_v20 = vrot.slane %v295_v10, 5  ;;  %1058 = vmatmul.mubr.msk.bf16.gmra.mxu1 %vm326_vm0, %v965_v11  ;;  %v257_v21 = vrot.slane %v256_v12, 4  ;;  %v273_v22 = vshll.u32 %v187_v3, 16  ;;  %v287_v23 = vshll.u32 %v188_v8, 16  ;;  %v994_v2 = vld [vmem:[%s1159_s25 + $0x18] sm:$0xf] }
  0x20   : > { %v261_v25 = vrot.slane %v259_v17, 5  ;;  %v271_v26 = vrot.slane %v270_v18, 4  ;;  %v284_v27 = vor.u32 %v283_v15, %v280_v9  ;;  %v301_v28 = vshll.u32 %v189_v13, 16  ;;  %v1098_v53 = vld [vmem:[%s1159_s25 + $0x8] ss:$8 sps:$4 sm:$0xff]  }
  0x21   : > { %v275_v30 = vrot.slane %v273_v22, 5  ;;  %v289_v31 = vrot.slane %v287_v23, 5  ;;  %v298_v32 = vor.u32 %v297_v20, %v294_v16  ;;  %v647_v34 = vshrl.u32 %v990_v14, 16  ;;  %v997_v57 = vld [vmem:[%s1159_s25 + $0x24] sm:$0x1] }
  0x22   : > { %v262_v35 = vsel %vm1172_vm3, %v257_v21, %v261_v25  ;;  %v285_v36 = vrot.slane %v284_v27, 4  ;;  %v303_v37 = vrot.slane %v301_v28, 5  ;;  %v650_v38 = vshll.u32 %v990_v14, 16  ;;  %v998_v63 = vld [vmem:[%s1159_s25 + $0x28] sm:$0xf] }
  0x23   : > { %v276_v40 = vsel %vm1172_vm3, %v271_v26, %v275_v30  ;;  %v299_v41 = vrot.slane %v298_v32, 4  ;;  %v649_v42 = vrot.slane %v647_v34, 4  ;;  %v656_v43 = vshll.u32 %v991_v19, 16  ;;  %v999_v5 = vld [vmem:[%s1159_s25 + $0x2c] sm:$0x1] }
  0x24   : > { %v955_v45 = vcombine.low %v262_v35, %v276_v40  ;;  %v290_v46 = vsel %vm1172_vm3, %v285_v36, %v289_v31  ;;  %v652_v47 = vrot.slane %v650_v38, 5  ;;  %v661_v48 = vshrl.u32 %v992_v24, 16  ;;  %v1000_v10 = vld [vmem:[%s1159_s25 + $0x30] sm:$0xf]  ;;  %v1099_v14 = vld [vmem:[%s1159_s25 + $0x18] ss:$8 sps:$4 sm:$0xff]  }
  0x25   : > { %v304_v49 = vsel %vm1172_vm3, %v299_v41, %v303_v37  ;;  %v658_v50 = vrot.slane %v656_v43, 5  ;;  %v664_v51 = vshll.u32 %v992_v24, 16  ;;  %v670_v52 = vshll.u32 %v993_v29, 16  ;;  %v1001_v15 = vld [vmem:[%s1159_s25 + $0x34] sm:$0x1] }
  0x26   : > { %1047 = vmatprep.mubr.msk.bf16.mxu0 %vm326_vm0, %v955_v45  ;;  %v956_v54 = vcombine.low %v290_v46, %v304_v49  ;;  %v653_v55 = vor.u32 %v652_v47, %v649_v42  ;;  %v663_v56 = vrot.slane %v661_v48, 4  ;;  %v675_v58 = vshrl.u32 %v994_v2, 16  ;;  %v1002_v21 = vld [vmem:[%s1159_s25 + $0x38] sm:$0xf]  ;;  %v1003_v26 = vld [vmem:[%s1159_s25 + $0x3c] sm:$0x1] }
  0x27   : > { %v666_v59 = vrot.slane %v664_v51, 5  ;;  %v672_v60 = vrot.slane %v670_v52, 5  ;;  %v678_v61 = vshll.u32 %v994_v2, 16  ;;  %v684_v62 = vshll.u32 %v995_v39, 16  ;;  %v1004_v31 = vld [vmem:[%s1159_s25 + $0x40] sm:$0xf] }
  0x28   : > { %1048 = vmatmul.mubr.msk.bf16.gmra.mxu0 %vm326_vm0, %v956_v54  ;;  %v654_v0 = vrot.slane %v653_v55, 4  ;;  %v677_v1 = vrot.slane %v675_v58, 4  ;;  %v689_v3 = vshrl.u32 %v996_v44, 16  ;;  %v692_v4 = vshll.u32 %v996_v44, 16  ;;  %v1005_v36 = vld [vmem:[%s1159_s25 + $0x44] sm:$0x1] }
  0x29   : > { %v667_v6 = vor.u32 %v666_v59, %v663_v56  ;;  %v680_v7 = vrot.slane %v678_v61, 5  ;;  %v686_v8 = vrot.slane %v684_v62, 5  ;;  %v698_v9 = vshll.u32 %v997_v57, 16  ;;  %1063 = vmatprep.mubr.msk.bf16.mxu0 %vm326_vm0, %v1098_v53  ;;  %v1100_v41 = vld [vmem:[%s1159_s25 + $0x28] ss:$8 sps:$4 sm:$0xff]  }
  0x2a   : > { %v659_v11 = vsel %vm1172_vm3, %v654_v0, %v658_v50  ;;  %v691_v12 = vrot.slane %v689_v3, 4  ;;  %v694_v13 = vrot.slane %v692_v4, 5  ;;  %v703_v16 = vshrl.u32 %v998_v63, 16  ;;  %v1101_v59 = vld [vmem:[%s1159_s25 + $0x38] ss:$8 sps:$4 sm:$0xff]  }
  0x2b   : > { %v668_v17 = vrot.slane %v667_v6, 4  ;;  %v681_v18 = vor.u32 %v680_v7, %v677_v1  ;;  %v700_v19 = vrot.slane %v698_v9, 5  ;;  %v706_v20 = vshll.u32 %v998_v63, 16 }
  0x2c   : > { %v695_v22 = vor.u32 %v694_v13, %v691_v12  ;;  %v705_v23 = vrot.slane %v703_v16, 4  ;;  %v712_v24 = vshll.u32 %v999_v5, 16  ;;  %v717_v25 = vshrl.u32 %v1000_v10, 16 }
  0x2d   : > { %v673_v27 = vsel %vm1172_vm3, %v668_v17, %v672_v60  ;;  %v682_v28 = vrot.slane %v681_v18, 4  ;;  %v708_v29 = vrot.slane %v706_v20, 5  ;;  %v720_v30 = vshll.u32 %v1000_v10, 16 }
  0x2e   : > { %v1008_v32 = vcombine.low %v659_v11, %v673_v27  ;;  %v696_v34 = vrot.slane %v695_v22, 4  ;;  %v714_v2 = vrot.slane %v712_v24, 5  ;;  %v719_v35 = vrot.slane %v717_v25, 4 }
  0x2f   : > { %v687_v37 = vsel %vm1172_vm3, %v682_v28, %v686_v8  ;;  %v709_v38 = vor.u32 %v708_v29, %v705_v23  ;;  %v722_v39 = vrot.slane %v720_v30, 5  ;;  %v726_v40 = vshll.u32 %v1001_v15, 16  ;;  %v1017_v30 = vld [vmem:[%s1282_s2] ss:$0 sm:$0xff] }
  0x30   : > { %1073 = vmatprep.mubr.msk.bf16.mxu1 %vm326_vm0, %v1008_v32  ;;  %v701_v42 = vsel %vm1172_vm3, %v696_v34, %v700_v19  ;;  %1064 = vmatmul.mubr.msk.bf16.vlgmr.msra.gmra.mxu0 %vm326_vm0, %v1099_v14  ;;  %v731_v43 = vshrl.u32 %v1002_v21, 16  ;;  %v734_v44 = vshll.u32 %v1002_v21, 16  ;;  %v740_v45 = vshll.u32 %v1003_v26, 16 }
  0x31   : > { %v1009_v46 = vcombine.low %v687_v37, %v701_v42  ;;  %v710_v47 = vrot.slane %v709_v38, 4  ;;  %v723_v48 = vor.u32 %v722_v39, %v719_v35  ;;  %v728_v49 = vrot.slane %v726_v40, 5  ;;  %1067 = vmatprep.mubr.msk.bf16.mxu0 %vm326_vm0, %v1100_v41 }
  0x32   : > { %v733_v50 = vrot.slane %v731_v43, 4  ;;  %v736_v51 = vrot.slane %v734_v44, 5  ;;  %v745_v52 = vshrl.u32 %v1004_v31, 16  ;;  %v748_v55 = vshll.u32 %v1004_v31, 16 }
  0x33   : > { %1074 = vmatmul.mubr.msk.bf16.vlgmr.msra.gmra.mxu1 %vm326_vm0, %v1009_v46  ;;  %v715_v53 = vsel %vm1172_vm3, %v710_v47, %v714_v2  ;;  %v724_v54 = vrot.slane %v723_v48, 4  ;;  %v754_v56 = vshll.u32 %v1005_v36, 16  ;;  %v742_v61 = vrot.slane %v740_v45, 5 }
  0x34   : > { %v737_v57 = vor.u32 %v736_v51, %v733_v50  ;;  %v747_v58 = vrot.slane %v745_v52, 4  ;;  %v750_v62 = vrot.slane %v748_v55, 5 }
  0x35   : > { %v729_v60 = vsel %vm1172_vm3, %v724_v54, %v728_v49  ;;  %v756_v3 = vrot.slane %v754_v56, 5 }
  0x36   : > { %v1010_v63 = vcombine.low %v715_v53, %v729_v60  ;;  %v738_v0 = vrot.slane %v737_v57, 4  ;;  %v751_v1 = vor.u32 %v750_v62, %v747_v58 }
  0x38   : > { %1077 = vmatprep.mubr.msk.bf16.mxu1 %vm326_vm0, %v1010_v63  ;;  %1068 = vmatmul.mubr.msk.bf16.gmra.mxu0 %vm326_vm0, %v1101_v59  ;;  %v743_v4 = vsel %vm1172_vm3, %v738_v0, %v742_v61  ;;  %v752_v5 = vrot.slane %v751_v1, 4 }
  0x3a   : > { %v757_v6 = vsel %vm1172_vm3, %v752_v5, %v756_v3 }
  0x3b   : > { %v1011_v7 = vcombine.low %v743_v4, %v757_v6 }
  0x3d   : > { %1078 = vmatmul.mubr.msk.bf16.gmra.mxu1 %vm326_vm0, %v1011_v7 }
  0xd6   : > { %v1055_v8 = vpop.f32.mrf.mxu1 }
  0xd8   : > { %v476_v9 = vpop.f32.mrf.mxu1 }
  0xda   : > { %v1056_v10 = vpop.f32.mrf.mxu1 }
  0xdc   : > { %v479_v12 = vpop.f32.mrf.mxu1 }
  0xde   : > { %v1045_v11 = vpop.f32.mrf.mxu0 }
  0xdf   : > { %v1059_v15 = vpop.f32.mrf.mxu1  ;;  %v485_v22 = vadd.f32 %v1055_v8, %v1045_v11 }
  0xe0   : > { %v373_v13 = vpop.f32.mrf.mxu0 }
  0xe1   : > { %v492_v17 = vpop.f32.mrf.mxu1  ;;  %v477_v25 = vadd.f32 %v476_v9, %v373_v13 }
  0xe2   : > { %v1046_v14 = vpop.f32.mrf.mxu0 }
  0xe3   : > { %v1060_v20 = vpop.f32.mrf.mxu1  ;;  %v488_v28 = vadd.f32 %v1056_v10, %v1046_v14 }
  0xe4   : > { %v376_v16 = vpop.f32.mrf.mxu0 }
  0xe5   : > { %v495_v23 = vpop.f32.mrf.mxu1  ;;  %v480_v2 = vadd.f32 %v479_v12, %v376_v16 }
  0xe8   : > { %v1049_v18 = vpop.f32.mrf.mxu0 }
  0xe9   : > { %v501_v45 = vadd.f32 %v1059_v15, %v1049_v18 }
  0xea   : > { %v389_v19 = vpop.f32.mrf.mxu0 }
  0xeb   : > { %v493_v50 = vadd.f32 %v492_v17, %v389_v19 }
  0xec   : > { %v1050_v21 = vpop.f32.mrf.mxu0 }
  0xed   : > { %v504_v54 = vadd.f32 %v1060_v20, %v1050_v21 }
  0xee   : > { %v392_v33 = vpop.f32.mrf.mxu0 }
  0xef   : > { %v496_v58 = vadd.f32 %v495_v23, %v392_v33 }
  0xf0   : > { %v1065_v24 = vpop.f32.mrf.mxu0 }
  0xf1   : > { %v624_v26 = vadd.f32 %v1065_v24, %v485_v22 }
  0xf2   : > { %v591_v27 = vpop.f32.mrf.mxu0 }
  0xf3   : > { %v1075_v29 = vpop.f32.mrf.mxu1  ;;  %v622_v31 = vadd.f32 %v591_v27, %v477_v25 }
  0xf4   : > { %v858_v32 = vadd.f32 %v1075_v29, %v624_v26  ;;  %v1066_v34 = vpop.f32.mrf.mxu0 }
  0xf5   : > { %v825_v35 = vpop.f32.mrf.mxu1  ;;  %v625_v36 = vadd.f32 %v1066_v34, %v488_v28 }
  0xf6   : > { %v873_v37 = vadd.f32 %v1017_v30, %v858_v32  ;;  %v856_v38 = vadd.f32 %v825_v35, %v622_v31  ;;  %v594_v39 = vpop.f32.mrf.mxu0 }
  0xf7   : > { %v1076_v40 = vpop.f32.mrf.mxu1  ;;  %v623_v41 = vadd.f32 %v594_v39, %v480_v2 }
  0xf8   : > { %882 = vst.msk [vmem:[%s1259_s4 + $0x10] sm:$0xff] %vm879_vm4, %v873_v37  ;;  %v871_v42 = vadd.f32 %v1017_v30, %v856_v38  ;;  %v859_v43 = vadd.f32 %v1076_v40, %v625_v36  ;;  %v1069_v44 = vpop.f32.mrf.mxu0 }
  0xf9   : > { %v828_v46 = vpop.f32.mrf.mxu1  ;;  %v628_v51 = vadd.f32 %v1069_v44, %v501_v45 }
  0xfa   : > { %880 = vst.msk [vmem:[%s1259_s4] sm:$0xff] %vm879_vm4, %v871_v42  ;;  %v874_v47 = vadd.f32 %v1017_v30, %v859_v43  ;;  %v857_v48 = vadd.f32 %v828_v46, %v623_v41  ;;  %v607_v49 = vpop.f32.mrf.mxu0 }
  0xfb   : > { %v626_v55 = vadd.f32 %v607_v49, %v493_v50 }
  0xfc   : > { %883 = vst.msk [vmem:[%s1259_s4 + $0x18] sm:$0xff] %vm879_vm4, %v874_v47  ;;  %v872_v52 = vadd.f32 %v1017_v30, %v857_v48  ;;  %v1070_v53 = vpop.f32.mrf.mxu0 }
  0xfd   : > { %v1079_v56 = vpop.f32.mrf.mxu1  ;;  %v629_v60 = vadd.f32 %v1070_v53, %v504_v54 }
  0xfe   : > { %881 = vst.msk [vmem:[%s1259_s4 + $0x8] sm:$0xff] %vm879_vm4, %v872_v52  ;;  %v610_v57 = vpop.f32.mrf.mxu0  ;;  %v862_v59 = vadd.f32 %v1079_v56, %v628_v51 }
  0xff   : > { %v841_v61 = vpop.f32.mrf.mxu1  ;;  %v627_v0 = vadd.f32 %v610_v57, %v496_v58 }
 0x100   : > { %v877_v62 = vadd.f32 %v1017_v30, %v862_v59  ;;  %v860_v63 = vadd.f32 %v841_v61, %v626_v55 }
 0x101   : > { %v1080_v1 = vpop.f32.mrf.mxu1 }
 0x102   : > { %886 = vst.msk [vmem:[%s1259_s4 + $0x30] sm:$0xff] %vm879_vm4, %v877_v62  ;;  %v875_v3 = vadd.f32 %v1017_v30, %v860_v63  ;;  %v863_v4 = vadd.f32 %v1080_v1, %v629_v60 }
 0x103   : > { %v844_v5 = vpop.f32.mrf.mxu1 }
 0x104   : > { %884 = vst.msk [vmem:[%s1259_s4 + $0x20] sm:$0xff] %vm879_vm4, %v875_v3  ;;  %v878_v6 = vadd.f32 %v1017_v30, %v863_v4  ;;  %v861_v7 = vadd.f32 %v844_v5, %v627_v0 }
 0x106   : > { %887 = vst.msk [vmem:[%s1259_s4 + $0x38] sm:$0xff] %vm879_vm4, %v878_v6  ;;  %v876_v8 = vadd.f32 %v1017_v30, %v861_v7 }
 0x108   : > { %885 = vst.msk [vmem:[%s1259_s4 + $0x28] sm:$0xff] %vm879_vm4, %v876_v8 }
 0x109 PF: > { %s13_s12 = sadd.s32 1, %s1108_s12  }
 0x10a   : > { %p10_p4 = scmp.ge.s32.totalorder %s13_s12, 4  }
 0x10c   :  { %12 = sbr.rel (!%p10_p4) target bundleno = 1 (0x1), region = 66 }

</bundles_post_ra>
